<compile_context>
chip_gen: v7x
topology: tpu7x:2x2x1
jax: 0.10.0
libtpu: 0.0.40
codegen_flags: <defaults>
</compile_context>

<pallas_src>
import functools
import math

import jax
import jax.numpy as jnp
from jax.experimental import pallas as pl
from jax.experimental.pallas import tpu as pltpu


# ----------------------------------------------------------------------------
# Kernels
# ----------------------------------------------------------------------------
def _pe_add_kernel(x_ref, pe_ref, o_ref, *, t_tile):
    """out = x + pe  (pe rows sliced by the time-tile grid index)."""
    t = pl.program_id(1)
    row = pl.multiple_of(t * t_tile, t_tile)
    pe_blk = pe_ref[pl.ds(row, t_tile), :]                 # (t_tile, C), same dtype as x
    o_ref[...] = (x_ref[...] + pe_blk[None, :, :]).astype(o_ref.dtype)


def _pe_add_dropout_kernel(seed_ref, x_ref, pe_ref, o_ref, *,
                           t_tile, drop_thresh, scale):
    """out = inverted_dropout(x + pe), using the TPU hardware PRNG."""
    b = pl.program_id(0)
    t = pl.program_id(1)
    nt = pl.num_programs(1)
    row = pl.multiple_of(t * t_tile, t_tile)
    pe_blk = pe_ref[pl.ds(row, t_tile), :]
    y = x_ref[...] + pe_blk[None, :, :]

    # Unique PRNG stream per (batch, time-tile) grid point.
    pltpu.prng_seed(seed_ref[0] + b * nt + t)
    bits = pltpu.bitcast(pltpu.prng_random_bits(y.shape), jnp.uint32)
    keep = bits >= jnp.uint32(drop_thresh)                 # P(keep) = 1 - p
    y = jnp.where(keep, y * jnp.asarray(scale, y.dtype), jnp.zeros((), y.dtype))
    o_ref[...] = y.astype(o_ref.dtype)


# ----------------------------------------------------------------------------
# Wrapper
# ----------------------------------------------------------------------------
def temporal_positional_encoding(x, pe, *, dropout_p=0.0, training=False,
                                 seed=0, target_block_bytes=2 << 20):
    """Pallas forward pass of TemporalPositionalEncoding.

    x:  (B, T, S, D)  -- batch, seq_len, num_slots, token_dim
    pe: (1, max_len, 1, D)
    """
    B, T, S, D = x.shape
    assert pe.shape[0] == 1 and pe.shape[2] == 1 and pe.shape[3] == D
    assert T <= pe.shape[1]
    C = S * D
    itemsize = jnp.dtype(x.dtype).itemsize

    use_dropout = bool(training) and float(dropout_p) > 0.0
    if use_dropout and float(dropout_p) >= 1.0:
        return jnp.zeros_like(x)                           # torch Dropout(p=1) zeroes all

    # --- tiny wrapper-side PE prep (O(T*S*D), no batch dim) ------------------
    pe_rows = jnp.flip(pe[0, :T, 0, :], axis=0)                     # (T, D), time-flipped
    pe_exp = jnp.broadcast_to(pe_rows[:, None, :], (T, S, D))       # repeat across slots
    pe_exp = pe_exp.reshape(T, C).astype(x.dtype)                   # lane-dense slab

    # --- sequence tiling: lane-dense minor dim C, ~target_block_bytes/block --
    rows_per_block = max(1, target_block_bytes // max(1, C * itemsize))
    if rows_per_block >= T:
        t_tile = T                                   # one block covers the whole sequence
    else:
        t_tile = max(8, (rows_per_block // 8) * 8)   # (8, 128) sublane rule
        t_tile = min(t_tile, T)
    nt = pl.cdiv(T, t_tile)
    t_pad = nt * t_tile
    if t_pad != T:
        pe_exp = jnp.pad(pe_exp, ((0, t_pad - T), (0, 0)))   # keep in-kernel pe slice in bounds

    x2 = x.reshape(B, T, C)

    x_spec = pl.BlockSpec((1, t_tile, C), lambda b, t, *_: (b, t, 0))
    pe_spec = pl.BlockSpec((t_pad, C), lambda b, t, *_: (0, 0))      # constant -> fetched once
    o_spec = pl.BlockSpec((1, t_tile, C), lambda b, t, *_: (b, t, 0))

    cost = pl.CostEstimate(
        flops=B * T * C,
        transcendentals=0,
        bytes_accessed=(2 * B * T * C + t_pad * C) * itemsize,
    )
    # x/out double-buffered blocks + resident PE slab + slack; sized to fit
    # v7x's smaller VMEM as well as v5e/v6e defaults.
    vmem_bytes = 4 * t_tile * C * itemsize + 2 * t_pad * C * itemsize + (2 << 20)
    compiler_params = pltpu.CompilerParams(
        dimension_semantics=("parallel", "parallel"),
        vmem_limit_bytes=max(int(vmem_bytes), 8 << 20),
    )

    if use_dropout:
        # TODO(synk): in-kernel dropout uses the TPU hardware PRNG (no
        # CPU/interpret-mode lowering, and cannot bit-match torch's RNG stream).
        p = float(dropout_p)
        drop_thresh = min(int(round(p * 4294967296.0)), 4294967295)
        kernel = functools.partial(_pe_add_dropout_kernel, t_tile=t_tile,
                                   drop_thresh=drop_thresh, scale=1.0 / (1.0 - p))
        grid_spec = pltpu.PrefetchScalarGridSpec(
            num_scalar_prefetch=1, grid=(B, nt),
            in_specs=[x_spec, pe_spec], out_specs=o_spec)
        seed_arr = jnp.array([seed], dtype=jnp.int32)
        out = pl.pallas_call(
            kernel,
            out_shape=jax.ShapeDtypeStruct((B, T, C), x.dtype),
            grid_spec=grid_spec,
            compiler_params=compiler_params,
            cost_estimate=cost,
        )(seed_arr, x2, pe_exp)
    else:
        kernel = functools.partial(_pe_add_kernel, t_tile=t_tile)
        grid_spec = pltpu.PrefetchScalarGridSpec(
            num_scalar_prefetch=0, grid=(B, nt),
            in_specs=[x_spec, pe_spec], out_specs=o_spec)
        out = pl.pallas_call(
            kernel,
            out_shape=jax.ShapeDtypeStruct((B, T, C), x.dtype),
            grid_spec=grid_spec,
            compiler_params=compiler_params,
            cost_estimate=cost,
        )(x2, pe_exp)

    return out.reshape(B, T, S, D)


# ----------------------------------------------------------------------------
# PE-table constructors (match torch _get_pe)
# ----------------------------------------------------------------------------
def make_sinusoid_pe(max_len, d_model, dtype=jnp.float32):
    position = jnp.arange(max_len, dtype=jnp.float32)[:, None]
    div_term = jnp.exp(jnp.arange(0, d_model, 2, dtype=jnp.float32)
                       * (-math.log(10000.0) / d_model))
    angles = position * div_term
    table = jnp.zeros((max_len, d_model), dtype=jnp.float32)
    table = table.at[:, 0::2].set(jnp.sin(angles))
    table = table.at[:, 1::2].set(jnp.cos(angles))
    return table.reshape(1, max_len, 1, d_model).astype(dtype)


def reference_forward(x, pe):
    T = x.shape[1]
    cur_pe = jnp.flip(pe[:, :T], axis=1)          # (1, T, 1, D) broadcasts over B, S
    return x + cur_pe


# ----------------------------------------------------------------------------
# Demo / self-check
# ----------------------------------------------------------------------------
if __name__ == "__main__":
    key = jax.random.PRNGKey(0)
    k1, k2 = jax.random.split(key)

    # Case 1: B=2, seq T=8, num_slots S=4, d_model D=32 (S*D = 128 lane-dense),
    #         max_len=50 (module default), sinusoid mode, dropout p=0.0 (default).
    B, T, S, D = 2, 8, 4, 32
    MAX_LEN = 50
    x = jax.random.normal(k1, (B, T, S, D), dtype=jnp.float32)
    pe = make_sinusoid_pe(MAX_LEN, D)

    y = temporal_positional_encoding(x, pe, dropout_p=0.0, training=False)
    y = jax.block_until_ready(y)
    ref = reference_forward(x, pe)
    assert y.shape == x.shape
    assert jnp.allclose(y, ref, atol=1e-6, rtol=1e-6), "case 1 mismatch vs reference"

    # Case 2: force the time-tiling path (T not divisible by the tile) to
    #         exercise partial blocks + padded-PE slicing.
    B2, T2, S2, D2 = 2, 12, 4, 128
    x2 = jax.random.normal(k2, (B2, T2, S2, D2), dtype=jnp.float32)
    pe2 = make_sinusoid_pe(MAX_LEN, D2)
    y2 = temporal_positional_encoding(x2, pe2, dropout_p=0.0, training=False,
                                      target_block_bytes=8 * S2 * D2 * 4)
    y2 = jax.block_until_ready(y2)
    ref2 = reference_forward(x2, pe2)
    assert jnp.allclose(y2, ref2, atol=1e-6, rtol=1e-6), "case 2 mismatch vs reference"

    print("KERNEL_OK")
</pallas_src>

<mosaic_0001>
module attributes {stable_mosaic.version = 11 : i64} {
  func.func @_pe_add_kernel(%arg0: i32, %arg1: i32, %arg2: memref<1x8x128xf32, #tpu.memory_space<vmem>>, %arg3: memref<8x128xf32, #tpu.memory_space<vmem>>, %arg4: memref<1x8x128xf32, #tpu.memory_space<vmem>>) attributes {dimension_semantics = [#tpu.dimension_semantics<parallel>, #tpu.dimension_semantics<parallel>], iteration_bounds = array<i64: 2, 1>, scalar_prefetch = 0 : i64, scratch_operands = 0 : i64, tpu.core_type = #tpu.core_type<tc>, window_params = [{transform_indices = @transform_0, window_bounds = array<i64: 1, 8, 128>}, {pipeline_mode = #tpu.pipeline_mode<synchronous>, transform_indices = @transform_1, window_bounds = array<i64: 8, 128>}, {transform_indices = @transform_2, window_bounds = array<i64: 1, 8, 128>}]} {
    %c8_i32 = arith.constant 8 : i32
    %0 = arith.muli %arg1, %c8_i32 : i32
    %1 = tpu.assume_multiple %0, 8 : i32
    %2 = arith.index_cast %1 : i32 to index
    %c0 = arith.constant 0 : index
    %3 = vector.load %arg3[%2, %c0] : memref<8x128xf32, #tpu.memory_space<vmem>>, vector<8x128xf32>
    %c0_0 = arith.constant 0 : index
    %c0_1 = arith.constant 0 : index
    %c0_2 = arith.constant 0 : index
    %4 = vector.load %arg2[%c0_0, %c0_1, %c0_2] : memref<1x8x128xf32, #tpu.memory_space<vmem>>, vector<1x8x128xf32>
    %5 = vector.shape_cast %3 : vector<8x128xf32> to vector<1x8x128xf32>
    %6 = arith.addf %4, %5 : vector<1x8x128xf32>
    %c0_3 = arith.constant 0 : index
    %c0_4 = arith.constant 0 : index
    %c0_5 = arith.constant 0 : index
    %7 = vector.load %arg4[%c0_3, %c0_4, %c0_5] : memref<1x8x128xf32, #tpu.memory_space<vmem>>, vector<1x8x128xf32>
    tpu.vector_store %arg4[%c0_3, %c0_4, %c0_5], %6 {strides = array<i32>} : memref<1x8x128xf32, #tpu.memory_space<vmem>>, vector<1x8x128xf32>,
    return
  }
  func.func @transform_0(%arg0: i32, %arg1: i32) -> (i32, i32, i32) {
    %c0_i32 = arith.constant 0 : i32
    %c0_i32_0 = arith.constant 0 : i32
    return %arg0, %arg1, %c0_i32 : i32, i32, i32
  }
  func.func @transform_1(%arg0: i32, %arg1: i32) -> (i32, i32) {
    %c0_i32 = arith.constant 0 : i32
    %c0_i32_0 = arith.constant 0 : i32
    %c0_i32_1 = arith.constant 0 : i32
    return %c0_i32, %c0_i32_0 : i32, i32
  }
  func.func @transform_2(%arg0: i32, %arg1: i32) -> (i32, i32, i32) {
    %c0_i32 = arith.constant 0 : i32
    %c0_i32_0 = arith.constant 0 : i32
    return %arg0, %arg1, %c0_i32 : i32, i32, i32
  }
}

</mosaic_0001>

<bundles_post_ra>
// kernel: tpu_custom_call.1
= control target key start
LH: loop header
LB: loop body
LE: loop exit
PB: predicated region body
PF: predicated region fallthrough
CT: control target
= control target key end

     0   :  { %7 = vsyncpa [#allocation3], 0  ;;  %s770_s0 = inlined_call_operand.hbm [shape: f32[2,8,128], index: 0, kind: input, shape index: {}]   ;;  %s771_s1 = inlined_call_operand.hbm [shape: f32[8,128], index: 1, kind: input, shape index: {}]   ;;  %s772_s2 = inlined_call_operand.hbm [shape: f32[2,8,128], index: 2, kind: output, shape index: {}]  }
   0x1   :  { %9 = vsyncpa [#allocation3 + $0x1], 0 }
   0x2   :  { %10 = vsyncpa [#allocation6], 0 }
   0x3   :  { %11 = vsyncpa [#allocation4], 0 }
   0x4   :  { %13 = vsyncpa [#allocation4 + $0x1], 0  ;;  %s554_s9 = smov 0   ;;  %s556_s10 = smov 0  }
   0x5   :  { %s558_s11 = smov 0   ;;  %s560_s12 = smov 0  }
   0x6   :  { %s562_s13 = smov 0   ;;  %s564_s14 = smov 0  }
   0x7 LB: > { %s302_s15 = sadd.s32 4294967295, %s534_s14   ;;  %s303_s16 = sadd.s32 4294967294, %s534_s14   ;;  %s534_s14 = sphi %s564_s14, %s19_s14   ;;  %s530_s13 = sphi %s562_s13, %s797_s13   ;;  %s526_s12 = sphi %s560_s12, %s796_s12   ;;  %s522_s11 = sphi %s558_s11, %s795_s11   ;;  %s518_s10 = sphi %s556_s10, %s794_s10   ;;  %s514_s9 = sphi %s554_s9, %s793_s9  }
   0x8   : > { %p53_p0 = scmp.ne.s32.totalorder %s518_s10, %s514_s9  ;;  %p588_p1 = scmp.eq.s32.totalorder %s302_s15, 0 }
   0x9   : > { %p592_p2 = scmp.eq.s32.totalorder %s302_s15, 1  ;;  %p106_p3 = scmp.eq.s32.totalorder %s303_s16, 1 }
   0xa   : > { %s777_s17 = scalar_select %p588_p1, 1, 0 }
   0xb   : > { %s778_s18 = scalar_select %p592_p2, 1, 0 }
   0xc   : > { %p598_p4 = por %p588_p1, %p53_p0  ;;  %p304_p5 = scmp.ge.s32.totalorder %s534_s14, 1 }
   0xd   : > { %p603_p6 = por %p106_p3, %p53_p0  ;;  %p113_p7 = scmp.lt.s32.totalorder %s534_s14, 3 }
   0xe   : > { %s779_s19 = scalar_select %p598_p4, 1, 0 }
   0xf   : > { %s780_s20 = scalar_select %p603_p6, 1, 0 }
  0x10   : > { %p608_p8 = pnand %p304_p5, %p113_p7  ;;  %s536_s22 = smov [#allocation5]  }
  0x11   : > { %s126_s23 = sshll.u32 %s536_s22, 4  ;;  %s31_s25 = sadd.s32 1, %s530_s13  ;;  %s127_s23 = int_to_ptr.vmem [resolvable:$true] %s126_s23 }
  0x12   : > { %s781_s21 = scalar_select %p608_p8, 1, 0 }
  0x13   : > { %p325_p10 = pneg %p608_p8  ;;  %s40_s26 = sadd.s32 1, %s522_s11 }
  0x14   : > { %p623_p12 = scmp.ge.s32.totalorder %s31_s25, 2  ;;  %s390_s30 = scalar_lea.hbm %s771_s1, 128 }
  0x15   : > { %p617_p11 = pnand %p325_p10, %p588_p1  ;;  %p391_p13 = scmp.ne.s32.totalorder %s771_s1, %s390_s30 }
  0x16   : > { %s783_s27 = scalar_select %p623_p12, 1, 0 }
  0x17   : > { %p392_p0 = pneg %p617_p11  ;;  %p397_p7 = scmp.lt.u32.totalorder %s390_s30, %s771_s1 }
  0x19   : > { %p393_p3 = pnand %p392_p0, %p391_p13 }
  0x1b   : > { %p394_p5 = pneg %p393_p3 }
  0x1d   : > { %p399_p10 = pnand %p397_p7, %p394_p5 }
  0x1f   : > { %402 = shalt.err (!%p399_p10)
}
  0x20   : > { %s403_s7 = scalar_lea.vmem %s127_s23, 128  ;;  %p411_p4 = scmp.lt.s32.totalorder %s127_s23, %s127_s23 }
  0x21   : > { %p404_p9 = scmp.ne.s32.totalorder %s127_s23, %s403_s7  ;;  %p412_p8 = scmp.lt.s32.totalorder %s403_s7, %s403_s7 }
  0x23   : > { %p406_p6 = pnand %p404_p9, %p392_p0  ;;  %p413_p2 = por %p412_p8, %p411_p4 }
  0x25   : > { %p407_p1 = pneg %p406_p6 }
  0x27   : > { %p414_p12 = pnand %p413_p2, %p407_p1 }
  0x29   : > { %417 = shalt.err (!%p414_p12)
}
  0x2a   : > { %328 = dma.hbm_to_vmem [thread:$0]  (!%p617_p11), %s771_s1, 128, %s127_s23, [#allocation6]  }
  0x2b   : > { %p784_p4 = scmp.ne.s32.totalorder %s783_s27, 0  ;;  %p47_p1 = scmp.ne.s32.totalorder %s522_s11, %s518_s10 }
  0x2c   : > { %p48_p2 = scmp.eq.s32.totalorder %s534_s14, 0  ;;  %p338_p6 = scmp.lt.s32.totalorder %s534_s14, 2 }
  0x2d   : > { %s799_s25 = smov (%p784_p4, %s31_s25), 0  ;;  %p785_p12 = scmp.ne.s32.totalorder %s778_s18, 0 }
  0x2e   : > { %s35_s16 = ssub.s32 %s530_s13, %s799_s25  ;;  %p49_p9 = por %p48_p2, %p47_p1 }
  0x2f   : > { %p38_p8 = scmp.eq.s32.totalorder %s35_s16, 0  ;;  %p655_p13 = por %p785_p12, %p47_p1 }
  0x30   : > { %s137_s24 = sand.u32 1, %s522_s11   ;;  %s308_s27 = sshll.u32 %s530_s13, 7 }
  0x31   : > { %s663_s28 = scalar_select %p38_p8, %s522_s11, %s40_s26  }
  0x32   : > { %s307_s23 = sshll.u32 %s137_s24, 3  ;;  %s669_s3 = scalar_lea.hbm %s770_s0, %s308_s27 }
  0x33   : > { %s141_s18 = scalar_lea.vmem [#allocation2], %s307_s23  ;;  %p673_p11 = pnand %p338_p6, %p49_p9 }
  0x34   : > { %s149_s4 = sshll.u32 %s141_s18, 4  ;;  %s138_s26 = scalar_lea.sflag [#allocation3], %s137_s24  ;;  %s671_s4 = int_to_ptr.vmem [resolvable:$true] %s149_s4 }
  0x35   : > { %s418_s6 = scalar_lea.hbm %s669_s3, 128  ;;  %p420_p3 = pneg %p673_p11 }
  0x36   : > { %p419_p0 = scmp.ne.s32.totalorder %s669_s3, %s418_s6  ;;  %s423_s15 = scalar_lea.hbm %s770_s0, 256 }
  0x37   : > { %p424_p10 = scmp.lt.u32.totalorder %s669_s3, %s770_s0  ;;  %p425_p4 = scmp.lt.u32.totalorder %s423_s15, %s418_s6 }
  0x38   : > { %p421_p5 = pnand %p420_p3, %p419_p0  ;;  %p427_p2 = scmp.lt.u32.totalorder %s418_s6, %s669_s3 }
  0x39   : > { %p426_p1 = por %p425_p4, %p424_p10 }
  0x3a   : > { %p422_p7 = pneg %p421_p5 }
  0x3b   : > { %p428_p6 = por %p427_p2, %p426_p1 }
  0x3d   : > { %p429_p8 = pnand %p428_p6, %p422_p7 }
  0x3f   : > { %432 = shalt.err (!%p429_p8)
}
  0x40   : > { %s433_s24 = scalar_lea.vmem %s671_s4, 128  ;;  %s537_s27 = smov [#allocation2]  }
  0x41   : > { %p434_p9 = scmp.ne.s32.totalorder %s671_s4, %s433_s24  ;;  %s438_s29 = sshll.u32 %s537_s27, 4  ;;  %s439_s29 = int_to_ptr.vmem [resolvable:$false] %s438_s29 }
  0x42   : > { %s440_s30 = scalar_lea.vmem %s439_s29, 256  ;;  %p441_p5 = scmp.lt.s32.totalorder %s671_s4, %s439_s29 }
  0x43   : > { %p436_p12 = pnand %p434_p9, %p420_p3  ;;  %p442_p10 = scmp.lt.s32.totalorder %s440_s30, %s433_s24 }
  0x45   : > { %p437_p0 = pneg %p436_p12  ;;  %p443_p4 = por %p442_p10, %p441_p5 }
  0x47   : > { %p444_p1 = pnand %p443_p4, %p437_p0 }
  0x49   : > { %447 = shalt.err (!%p444_p1)
}
  0x4a   : > { %332 = dma.hbm_to_vmem [thread:$0]  (!%p673_p11), %s669_s3, 128, %s671_s4, %s138_s26  }
  0x4b   : > { %p788_p7 = scmp.ne.s32.totalorder %s781_s21, 0 }
  0x4c   : > { %s705_s18 = sand.u32 (!%p788_p7), 1, %s518_s10   ;;  %p789_p3 = scmp.ne.s32.totalorder (!%p788_p7), %s779_s19, 0 }
  0x4d   : > { %158 = sbr.rel (%p788_p7) target bundleno = 113 (0x71), region = 28  ;;  %s310_s6 = sshll.u32 (!%p788_p7), %s705_s18, 3 }
  0x4e   : > { %s161_s7 = scalar_lea.sflag (!%p788_p7), [#allocation3], %s705_s18  ;;  %s164_s8 = scalar_lea.vmem (!%p788_p7), [#allocation2], %s310_s6 }
  0x54   : > { %501 = dma.done.wait (%p789_p3), %s161_s7, 128  }
  0x55   : > { %503 = vsyncadd (%p789_p3), %s161_s7, 4294967168  ;;  %p790_p2 = scmp.ne.s32.totalorder %s777_s17, 0 }
  0x57   : > { %505 = dma.done.wait (%p790_p2), [#allocation6], 128  }
  0x58   : > { %507 = vsyncadd (%p790_p2), [#allocation6], 4294967168  ;;  %s188_s21 = scalar_lea.vmem [#allocation7], %s310_s6  ;;  %s314_s4 = sshll.u32 %s526_s12, 7  ;;  %v191_v0 = vld [vmem:[#allocation5] sm:$0xff]  ;;  %v192_v1 = vld [vmem:[%s164_s8] sm:$0xff] }
  0x59   : > { %s210_s3 = sshll.u32 %s188_s21, 4  ;;  %v193_v2 = vadd.f32 %v192_v1, %v191_v0  ;;  %s723_s26 = scalar_lea.hbm %s772_s2, %s314_s4  ;;  %s718_s3 = int_to_ptr.vmem [resolvable:$true] %s210_s3 }
  0x5a   : > { %s196_s17 = scalar_lea.sflag [#allocation4], %s705_s18  ;;  %s448_s15 = scalar_lea.vmem %s718_s3, 128 }
  0x5b   : > { %194 = vst [vmem:[%s188_s21] sm:$0xff] %v193_v2  ;;  %p449_p11 = scmp.ne.s32.totalorder %s718_s3, %s448_s15  ;;  %s538_s12 = smov [#allocation7]  }
  0x5c   : > { %s452_s16 = sshll.u32 %s538_s12, 4  ;;  %s453_s16 = int_to_ptr.vmem [resolvable:$false] %s452_s16 }
  0x5d   : > { %p450_p6 = pnand %p449_p11, %p655_p13  ;;  %s454_s23 = scalar_lea.vmem %s453_s16, 256 }
  0x5e   : > { %p455_p9 = scmp.lt.s32.totalorder %s718_s3, %s453_s16  ;;  %p456_p12 = scmp.lt.s32.totalorder %s454_s23, %s448_s15 }
  0x5f   : > { %p451_p8 = pneg %p450_p6 }
  0x60   : > { %p457_p0 = por %p456_p12, %p455_p9 }
  0x62   : > { %p458_p5 = pnand %p457_p0, %p451_p8 }
  0x64   : > { %461 = shalt.err (!%p458_p5)
}
  0x65   : > { %s462_s24 = scalar_lea.hbm %s723_s26, 128  ;;  %s466_s30 = scalar_lea.hbm %s772_s2, 256 }
  0x66   : > { %p463_p10 = scmp.ne.s32.totalorder %s723_s26, %s462_s24  ;;  %p467_p7 = scmp.lt.u32.totalorder %s723_s26, %s772_s2 }
  0x67   : > { %p468_p3 = scmp.lt.u32.totalorder %s466_s30, %s462_s24  ;;  %p470_p11 = scmp.lt.u32.totalorder %s462_s24, %s723_s26 }
  0x68   : > { %p464_p4 = pnand %p463_p10, %p655_p13 }
  0x69   : > { %p469_p2 = por %p468_p3, %p467_p7 }
  0x6a   : > { %p465_p1 = pneg %p464_p4 }
  0x6b   : > { %p471_p6 = por %p470_p11, %p469_p2 }
  0x6d   : > { %p472_p8 = pnand %p471_p6, %p465_p1 }
  0x6f   : > { %475 = shalt.err (!%p472_p8)
}
  0x70   : > { %323 = dma.vmem_to_hbm [thread:$0]  (%p655_p13), %s718_s3, 128, %s723_s26, %s196_s17  }
  0x71 PF: > { %s222_s7 = sand.u32 1, %s514_s9   ;;  %p791_p9 = scmp.ne.s32.totalorder %s780_s20, 0 }
  0x72   : > { %p792_p12 = scmp.ge.s32.totalorder %s534_s14, 2  ;;  %s223_s8 = scalar_lea.sflag [#allocation4], %s222_s7 }
  0x74   : > { %p334_p0 = pnand %p792_p12, %p791_p9 }
  0x76   : > { %509 = dma.done.wait (!%p334_p0), %s223_s8, 128  }
  0x77   : > { %511 = vsyncadd (!%p334_p0), %s223_s8, 4294967168  ;;  %s19_s14 = sadd.s32 1, %s534_s14   ;;  %s793_s9 = smov %s518_s10 }
  0x78   : > { %p16_p5 = scmp.ge.s32.totalorder %s19_s14, 4   ;;  %s794_s10 = smov %s522_s11 }
  0x79   : > { %s795_s11 = smov %s663_s28  ;;  %s796_s12 = smov %s530_s13 }
  0x7a   : > { %s797_s13 = smov %s799_s25  ;;  %18 = sbr.rel (!%p16_p5) target bundleno = 7 (0x7), region = 78 }
  0x81   :  { %228 = vsyncpa [#allocation3], 1 }
  0x82   :  { %230 = vsyncpa [#allocation3 + $0x1], 1 }
  0x83   :  { %231 = vsyncpa [#allocation6], 1 }
  0x84   :  { %232 = vsyncpa [#allocation4], 1 }
  0x85   :  { %234 = vsyncpa [#allocation4 + $0x1], 1 }

</bundles_post_ra>
